<compile_context>
chip_gen: v6e
topology: v6e:2x2x1
jax: 0.10.0
libtpu: 0.0.40
codegen_flags: <defaults>
</compile_context>

<pallas_src>
import jax
import jax.numpy as jnp
from jax.experimental import pallas as pl
from jax.experimental.pallas import tpu as pltpu

num_action = 2
num_latent = 1
num_states = 3
INPUT_DIM = num_states + num_action + num_latent  # 6


def _round_up(n, m):
    return ((n + m - 1) // m) * m


def _mlp_kernel(x_ref, w1_ref, b1_ref, w2_ref, b2_ref, o_ref):
    # One batch tile: x (TILE_B, IN) -> o (TILE_B, OUT).
    x = x_ref[...].astype(jnp.float32)      # DMA stream may be bf16; compute in f32
    w1 = w1_ref[...].astype(jnp.float32)
    in_dim = x.shape[1]

    # fc1: K = 6 is far too shallow for the MXU, so do it as K broadcast-FMAs
    # on the VPU.  Static unroll (in_dim is a trace-time constant).
    acc = x[:, 0:1] * w1[0:1, :]
    for k in range(1, in_dim):
        acc = acc + x[:, k:k + 1] * w1[k:k + 1, :]

    # Bias add + tanh in f32; b1 is a (1, H) block broadcast over rows.
    h = jnp.tanh(acc + b1_ref[...].astype(jnp.float32))

    # fc2: K = hidden is deep enough for the MXU; accumulate in f32.
    out = jnp.dot(h.astype(w2_ref.dtype), w2_ref[...],
                  preferred_element_type=jnp.float32)
    o_ref[...] = (out + b2_ref[...].astype(jnp.float32)).astype(o_ref.dtype)


def ts_multi_mlp(x, w1, b1, w2, b2, *, tile_b=1024, matmul_dtype=None):
    """x: [B, in_dim]; w1: [in_dim, H]; b1: [1, H]; w2: [H, out]; b2: [1, out]
    -> [B, out] float32 (activations kept in f32, like the torch module)."""
    B, in_dim = x.shape
    hidden = w1.shape[1]
    out_dim = w2.shape[1]

    if matmul_dtype is not None:
        # Narrow only the big streaming operand + weights; biases stay f32.
        x = x.astype(matmul_dtype)
        w1 = w1.astype(matmul_dtype)
        w2 = w2.astype(matmul_dtype)
    b1 = b1.astype(jnp.float32)
    b2 = b2.astype(jnp.float32)

    # Batch tile: multiple of 8 (sublane), no bigger than the (padded) batch.
    tile_b = min(int(tile_b), _round_up(B, 8))
    tile_b = _round_up(tile_b, 8)
    b_pad = _round_up(B, tile_b)
    if b_pad != B:
        x = jnp.pad(x, ((0, b_pad - B), (0, 0)))
    grid = (b_pad // tile_b,)

    itemsize = jnp.dtype(x.dtype).itemsize
    cost = pl.CostEstimate(
        flops=2 * b_pad * (in_dim * hidden + hidden * out_dim),
        transcendentals=b_pad * hidden,
        bytes_accessed=(b_pad * in_dim * itemsize            # x in
                        + b_pad * out_dim * 4                # out (f32)
                        + (in_dim + 1) * hidden * itemsize   # w1 + b1
                        + (hidden + 1) * out_dim * itemsize))

    out = pl.pallas_call(
        _mlp_kernel,
        out_shape=jax.ShapeDtypeStruct((b_pad, out_dim), jnp.float32),
        grid=grid,
        in_specs=[
            pl.BlockSpec((tile_b, in_dim), lambda i: (i, 0)),    # x: streamed
            pl.BlockSpec((in_dim, hidden), lambda i: (0, 0)),    # w1: resident
            pl.BlockSpec((1, hidden), lambda i: (0, 0)),         # b1: resident
            pl.BlockSpec((hidden, out_dim), lambda i: (0, 0)),   # w2: resident
            pl.BlockSpec((1, out_dim), lambda i: (0, 0)),        # b2: resident
        ],
        out_specs=pl.BlockSpec((tile_b, out_dim), lambda i: (i, 0)),
        compiler_params=pltpu.CompilerParams(
            dimension_semantics=("parallel",)),   # ~2x on v7x megacore
        cost_estimate=cost,
    )(x, w1, b1, w2, b2)
    return out[:B] if b_pad != B else out


def init_params(key, input_dim, hidden_dim, output_dim, dtype=jnp.float32):
    """Deterministic init mimicking torch.nn.Linear default (uniform +-1/sqrt(fan_in))."""
    k1, k2, k3, k4 = jax.random.split(key, 4)
    bound1 = 1.0 / jnp.sqrt(input_dim)
    bound2 = 1.0 / jnp.sqrt(hidden_dim)
    w1 = jax.random.uniform(k1, (input_dim, hidden_dim), dtype, -bound1, bound1)
    b1 = jax.random.uniform(k2, (1, hidden_dim), dtype, -bound1, bound1)
    w2 = jax.random.uniform(k3, (hidden_dim, output_dim), dtype, -bound2, bound2)
    b2 = jax.random.uniform(k4, (1, output_dim), dtype, -bound2, bound2)
    return w1, b1, w2, b2


if __name__ == "__main__":
    hidden_dim = 32
    output_dim = num_states  # next-state prediction, matches input state count

    key = jax.random.PRNGKey(0)
    kx, kp, kx2 = jax.random.split(key, 3)
    w1, b1, w2, b2 = init_params(kp, INPUT_DIM, hidden_dim, output_dim)

    # Small single-tile case (matches the torch spec shapes).
    batch = 8
    x = jax.random.normal(kx, (batch, INPUT_DIM), jnp.float32)
    out = jax.block_until_ready(ts_multi_mlp(x, w1, b1, w2, b2))
    ref = jnp.tanh(x @ w1 + b1) @ w2 + b2
    assert out.shape == (batch, output_dim)
    assert jnp.allclose(out, ref, atol=1e-5, rtol=1e-5)

    # Multi-tile case: exercises the batch grid + padding path.
    batch2 = 200
    x2 = jax.random.normal(kx2, (batch2, INPUT_DIM), jnp.float32)
    out2 = jax.block_until_ready(ts_multi_mlp(x2, w1, b1, w2, b2, tile_b=64))
    ref2 = jnp.tanh(x2 @ w1 + b1) @ w2 + b2
    assert out2.shape == (batch2, output_dim)
    assert jnp.allclose(out2, ref2, atol=1e-5, rtol=1e-5)

    # bf16-streamed variant (halves HBM traffic; f32 accumulation/tanh).
    out3 = jax.block_until_ready(
        ts_multi_mlp(x2, w1, b1, w2, b2, tile_b=64, matmul_dtype=jnp.bfloat16))
    assert jnp.allclose(out3, ref2, atol=3e-2, rtol=3e-2)

    print("KERNEL_OK")
</pallas_src>

<mosaic_0001>
module attributes {stable_mosaic.version = 11 : i64} {
  func.func @_mlp_kernel(%arg0: i32, %arg1: memref<8x6xf32, #tpu.memory_space<vmem>>, %arg2: memref<6x32xf32, #tpu.memory_space<vmem>>, %arg3: memref<1x32xf32, #tpu.memory_space<vmem>>, %arg4: memref<32x3xf32, #tpu.memory_space<vmem>>, %arg5: memref<1x3xf32, #tpu.memory_space<vmem>>, %arg6: memref<8x3xf32, #tpu.memory_space<vmem>>) attributes {dimension_semantics = [#tpu.dimension_semantics<parallel>], iteration_bounds = array<i64: 1>, scalar_prefetch = 0 : i64, scratch_operands = 0 : i64, tpu.core_type = #tpu.core_type<tc>, window_params = [{transform_indices = @transform_0, window_bounds = array<i64: 8, 6>}, {pipeline_mode = #tpu.pipeline_mode<synchronous>, transform_indices = @transform_1, window_bounds = array<i64: 6, 32>}, {pipeline_mode = #tpu.pipeline_mode<synchronous>, transform_indices = @transform_2, window_bounds = array<i64: 1, 32>}, {pipeline_mode = #tpu.pipeline_mode<synchronous>, transform_indices = @transform_3, window_bounds = array<i64: 32, 3>}, {pipeline_mode = #tpu.pipeline_mode<synchronous>, transform_indices = @transform_4, window_bounds = array<i64: 1, 3>}, {transform_indices = @transform_5, window_bounds = array<i64: 8, 3>}]} {
    %c0 = arith.constant 0 : index
    %c0_0 = arith.constant 0 : index
    %0 = vector.load %arg1[%c0, %c0_0] : memref<8x6xf32, #tpu.memory_space<vmem>>, vector<8x6xf32>
    %c0_1 = arith.constant 0 : index
    %c0_2 = arith.constant 0 : index
    %1 = vector.load %arg2[%c0_1, %c0_2] : memref<6x32xf32, #tpu.memory_space<vmem>>, vector<6x32xf32>
    %2 = vector.extract_strided_slice %0 {offsets = [0, 0], sizes = [8, 1], strides = [1, 1]} : vector<8x6xf32> to vector<8x1xf32>
    %3 = vector.extract_strided_slice %1 {offsets = [0, 0], sizes = [1, 32], strides = [1, 1]} : vector<6x32xf32> to vector<1x32xf32>
    %4 = vector.broadcast %2 : vector<8x1xf32> to vector<8x32xf32>
    %5 = vector.broadcast %3 : vector<1x32xf32> to vector<8x32xf32>
    %6 = arith.mulf %4, %5 : vector<8x32xf32>
    %7 = vector.extract_strided_slice %0 {offsets = [0, 1], sizes = [8, 1], strides = [1, 1]} : vector<8x6xf32> to vector<8x1xf32>
    %8 = vector.extract_strided_slice %1 {offsets = [1, 0], sizes = [1, 32], strides = [1, 1]} : vector<6x32xf32> to vector<1x32xf32>
    %9 = vector.broadcast %7 : vector<8x1xf32> to vector<8x32xf32>
    %10 = vector.broadcast %8 : vector<1x32xf32> to vector<8x32xf32>
    %11 = arith.mulf %9, %10 : vector<8x32xf32>
    %12 = arith.addf %6, %11 : vector<8x32xf32>
    %13 = vector.extract_strided_slice %0 {offsets = [0, 2], sizes = [8, 1], strides = [1, 1]} : vector<8x6xf32> to vector<8x1xf32>
    %14 = vector.extract_strided_slice %1 {offsets = [2, 0], sizes = [1, 32], strides = [1, 1]} : vector<6x32xf32> to vector<1x32xf32>
    %15 = vector.broadcast %13 : vector<8x1xf32> to vector<8x32xf32>
    %16 = vector.broadcast %14 : vector<1x32xf32> to vector<8x32xf32>
    %17 = arith.mulf %15, %16 : vector<8x32xf32>
    %18 = arith.addf %12, %17 : vector<8x32xf32>
    %19 = vector.extract_strided_slice %0 {offsets = [0, 3], sizes = [8, 1], strides = [1, 1]} : vector<8x6xf32> to vector<8x1xf32>
    %20 = vector.extract_strided_slice %1 {offsets = [3, 0], sizes = [1, 32], strides = [1, 1]} : vector<6x32xf32> to vector<1x32xf32>
    %21 = vector.broadcast %19 : vector<8x1xf32> to vector<8x32xf32>
    %22 = vector.broadcast %20 : vector<1x32xf32> to vector<8x32xf32>
    %23 = arith.mulf %21, %22 : vector<8x32xf32>
    %24 = arith.addf %18, %23 : vector<8x32xf32>
    %25 = vector.extract_strided_slice %0 {offsets = [0, 4], sizes = [8, 1], strides = [1, 1]} : vector<8x6xf32> to vector<8x1xf32>
    %26 = vector.extract_strided_slice %1 {offsets = [4, 0], sizes = [1, 32], strides = [1, 1]} : vector<6x32xf32> to vector<1x32xf32>
    %27 = vector.broadcast %25 : vector<8x1xf32> to vector<8x32xf32>
    %28 = vector.broadcast %26 : vector<1x32xf32> to vector<8x32xf32>
    %29 = arith.mulf %27, %28 : vector<8x32xf32>
    %30 = arith.addf %24, %29 : vector<8x32xf32>
    %31 = vector.extract_strided_slice %0 {offsets = [0, 5], sizes = [8, 1], strides = [1, 1]} : vector<8x6xf32> to vector<8x1xf32>
    %32 = vector.extract_strided_slice %1 {offsets = [5, 0], sizes = [1, 32], strides = [1, 1]} : vector<6x32xf32> to vector<1x32xf32>
    %33 = vector.broadcast %31 : vector<8x1xf32> to vector<8x32xf32>
    %34 = vector.broadcast %32 : vector<1x32xf32> to vector<8x32xf32>
    %35 = arith.mulf %33, %34 : vector<8x32xf32>
    %36 = arith.addf %30, %35 : vector<8x32xf32>
    %c0_3 = arith.constant 0 : index
    %c0_4 = arith.constant 0 : index
    %37 = vector.load %arg3[%c0_3, %c0_4] : memref<1x32xf32, #tpu.memory_space<vmem>>, vector<1x32xf32>
    %38 = vector.broadcast %37 : vector<1x32xf32> to vector<8x32xf32>
    %39 = arith.addf %36, %38 : vector<8x32xf32>
    %40 = math.tanh %39 : vector<8x32xf32>
    %c0_5 = arith.constant 0 : index
    %c0_6 = arith.constant 0 : index
    %41 = vector.load %arg4[%c0_5, %c0_6] : memref<32x3xf32, #tpu.memory_space<vmem>>, vector<32x3xf32>
    %cst = arith.constant dense<0.000000e+00> : vector<8x3xf32>
    %42 = tpu.matmul %40, %41, %cst {dimension_numbers = #tpu.dot_dimension_numbers<[1], [0], [0], [1], [0, 0, 1, 1], [], []>} : vector<8x32xf32>, vector<32x3xf32>, vector<8x3xf32> -> vector<8x3xf32>
    %c0_7 = arith.constant 0 : index
    %c0_8 = arith.constant 0 : index
    %43 = vector.load %arg5[%c0_7, %c0_8] : memref<1x3xf32, #tpu.memory_space<vmem>>, vector<1x3xf32>
    %44 = vector.broadcast %43 : vector<1x3xf32> to vector<8x3xf32>
    %45 = arith.addf %42, %44 : vector<8x3xf32>
    %c0_9 = arith.constant 0 : index
    %c0_10 = arith.constant 0 : index
    %46 = vector.load %arg6[%c0_9, %c0_10] : memref<8x3xf32, #tpu.memory_space<vmem>>, vector<8x3xf32>
    tpu.vector_store %arg6[%c0_9, %c0_10], %45 {strides = array<i32>} : memref<8x3xf32, #tpu.memory_space<vmem>>, vector<8x3xf32>,
    return
  }
  func.func @transform_0(%arg0: i32) -> (i32, i32) {
    %c0_i32 = arith.constant 0 : i32
    %c0_i32_0 = arith.constant 0 : i32
    return %arg0, %c0_i32 : i32, i32
  }
  func.func @transform_1(%arg0: i32) -> (i32, i32) {
    %c0_i32 = arith.constant 0 : i32
    %c0_i32_0 = arith.constant 0 : i32
    %c0_i32_1 = arith.constant 0 : i32
    return %c0_i32, %c0_i32_0 : i32, i32
  }
  func.func @transform_2(%arg0: i32) -> (i32, i32) {
    %c0_i32 = arith.constant 0 : i32
    %c0_i32_0 = arith.constant 0 : i32
    %c0_i32_1 = arith.constant 0 : i32
    return %c0_i32, %c0_i32_0 : i32, i32
  }
  func.func @transform_3(%arg0: i32) -> (i32, i32) {
    %c0_i32 = arith.constant 0 : i32
    %c0_i32_0 = arith.constant 0 : i32
    %c0_i32_1 = arith.constant 0 : i32
    return %c0_i32, %c0_i32_0 : i32, i32
  }
  func.func @transform_4(%arg0: i32) -> (i32, i32) {
    %c0_i32 = arith.constant 0 : i32
    %c0_i32_0 = arith.constant 0 : i32
    %c0_i32_1 = arith.constant 0 : i32
    return %c0_i32, %c0_i32_0 : i32, i32
  }
  func.func @transform_5(%arg0: i32) -> (i32, i32) {
    %c0_i32 = arith.constant 0 : i32
    %c0_i32_0 = arith.constant 0 : i32
    return %arg0, %c0_i32 : i32, i32
  }
}

</mosaic_0001>

<bundles_post_ra>
// kernel: tpu_custom_call.1
= control target key start
LH: loop header
LB: loop body
LE: loop exit
PB: predicated region body
PF: predicated region fallthrough
CT: control target
= control target key end

     0   :  { %v217_v0 = vmov 0   ;;  %v218_v1 = vmov 2   ;;  %v219_v3 = vmov 1   ;;  %v220_v4 = vmov 3   ;;  %s282_s0 = inlined_call_operand.vmem [shape: f32[8,6], index: 0, kind: input, shape index: {}]   ;;  %s283_s3 = inlined_call_operand.vmem [shape: f32[32,3], index: 3, kind: input, shape index: {}]   ;;  %s284_s1 = inlined_call_operand.vmem [shape: f32[6,32], index: 1, kind: input, shape index: {}]   ;;  %s285_s2 = inlined_call_operand.vmem [shape: f32[1,32], index: 2, kind: input, shape index: {}]   ;;  %s286_s4 = inlined_call_operand.vmem [shape: f32[1,3], index: 4, kind: input, shape index: {}]   ;;  %s287_s5 = inlined_call_operand.vmem [shape: f32[8,3], index: 5, kind: output, shape index: {}]  }
   0x1   :  { %209 = vset.pattern.permute.xlu0 %v217_v0  ;;  %211 = vset.pattern.permute.xlu1 %v218_v1  ;;  %v20_v2 = vld [vmem:[%s282_s0] sm:$0xff]  ;;  %v221_v5 = vmov 4   ;;  %v222_v6 = vmov 5   ;;  %v223_v7 = vmov 0.0   ;;  %v94_v8 = vld [vmem:[%s283_s3 + $0x18] sm:$0xff]  ;;  %v93_v9 = vld [vmem:[%s283_s3 + $0x10] sm:$0xff]  ;;  %v27_v12 = vlaneseq }
   0x2   :  { %24 = vperm.xlu0 %209, %v20_v2   ;;  %43 = vperm.xlu1 %211, %v20_v2   ;;  %vm224_vm0 = vmmov 0   ;;  %v92_v10 = vld [vmem:[%s283_s3 + $0x8] sm:$0xff]  ;;  %v91_v11 = vld [vmem:[%s283_s3] sm:$0xff]  ;;  %vm102_vm1 = vcmask 261120   ;;  %vm176_vm2 = vcmask 23552  }
   0x3   :  { %190 = vmatprep.subr.mxu0 %v223_v7  ;;  %198 = vmatprep.mubr.msk.f32.mxu0 %vm224_vm0, %v223_v7  ;;  %v28_v13 = vshrl.u32 %v27_v12, 7  ;;  %v21_v16 = vld [vmem:[%s284_s1] sm:$0x3f] }
   0x4   :  { %191 = vmatpush3.msra.mxu0 %v94_v8  ;;  %v182_v43 = vld [vmem:[%s285_s2] ss:$0 sm:$0xff] }
   0x5   :  { %192 = vmatprep.subr.mxu0 %v223_v7  ;;  %v29_v14 = vsub.s32 0, %v28_v13  ;;  %v38_v15 = vsub.s32 1, %v28_v13  ;;  %v48_v18 = vsub.s32 2, %v28_v13  ;;  %v58_v22 = vsub.s32 3, %v28_v13  ;;  %v183_v47 = vld [vmem:[%s286_s4] ss:$0 sm:$0xff] }
   0x6   :  { %210 = vset.pattern.permute.xlu0 %v219_v3  ;;  %212 = vset.pattern.permute.xlu1 %v220_v4  ;;  %v68_v23 = vsub.s32 4, %v28_v13  ;;  %v78_v25 = vsub.s32 5, %v28_v13 }
   0x7   :  { %33 = vperm.xlu0 %210, %v20_v2   ;;  %53 = vperm.xlu1 %212, %v20_v2   ;;  %v30_v20 = vrot.slane %v21_v16, %v29_v14  ;;  %v39_v21 = vrot.slane %v21_v16, %v38_v15  ;;  %v49_v24 = vrot.slane %v21_v16, %v48_v18 }
   0x8   :  { %193 = vmatpush3.msra.mxu0 %v93_v9  ;;  %v59_v30 = vrot.slane %v21_v16, %v58_v22  ;;  %v69_v31 = vrot.slane %v21_v16, %v68_v23  ;;  %v79_v34 = vrot.slane %v21_v16, %v78_v25 }
   0x9   :  { %194 = vmatprep.subr.mxu0 %v223_v7 }
   0xa   :  { %195 = vmatpush3.msra.mxu0 %v92_v10 }
   0xb   :  { %213 = vset.pattern.permute.xlu1 %v221_v5  ;;  %214 = vset.pattern.permute.xlu0 %v222_v6 }
   0xc   :  { %63 = vperm.xlu1 %213, %v20_v2   ;;  %73 = vperm.xlu0 %214, %v20_v2  }
   0xd   :  { %196 = vmatprep.subr.mxu0 %v223_v7 }
   0xe   :  { %197 = vmatpush3.msra.mxu0 %v91_v11 }
  0x7d   :  { %v25_v17 = vpop.permute.xlu0 %24  ;;  %v44_v19 = vpop.permute.xlu1 %43 }
  0x7e   :  { %v31_v28 = vmul.f32 %v30_v20, %v25_v17  ;;  %v50_v32 = vmul.f32 %v49_v24, %v44_v19 }
  0x82   :  { %v34_v26 = vpop.permute.xlu0 %33  ;;  %v54_v27 = vpop.permute.xlu1 %53 }
  0x83   :  { %v40_v29 = vmul.f32 %v39_v21, %v34_v26  ;;  %v60_v36 = vmul.f32 %v59_v30, %v54_v27 }
  0x85   :  { %v41_v33 = vadd.f32 %v40_v29, %v31_v28 }
  0x87   :  { %v51_v35 = vadd.f32 %v50_v32, %v41_v33  ;;  %v64_v37 = vpop.permute.xlu1 %63  ;;  %v74_v38 = vpop.permute.xlu0 %73 }
  0x88   :  { %v70_v39 = vmul.f32 %v69_v31, %v64_v37  ;;  %v80_v41 = vmul.f32 %v79_v34, %v74_v38 }
  0x89   :  { %v61_v40 = vadd.f32 %v60_v36, %v51_v35 }
  0x8b   :  { %v71_v42 = vadd.f32 %v70_v39, %v61_v40 }
  0x8d   :  { %v81_v44 = vadd.f32 %v80_v41, %v71_v42 }
  0x8f   :  { %v89_v45 = vadd.f32 %v182_v43, %v81_v44 }
  0x91   :  { %215 = vtanh.f32 %v89_v45 }
  0x9e   :  { %v216_v46 = vpop.eup %215 }
  0x9f   :  { %199 = vmatmul.mubr.msk.f32.vlgmr.msra.gmra.mxu0 %vm102_vm1, %v216_v46 }
 0x15f   :  { %v172_v48 = vpop.f32.mrf.mxu0 }
 0x160   :  { %v173_v49 = vadd.f32 %v183_v47, %v172_v48 }
 0x161   :  { %v200_v50 = vpop.f32.mrf.mxu0 }
 0x162   :  { %177 = vst.msk [vmem:[%s287_s5] sm:$0xff] %vm176_vm2, %v173_v49 }

</bundles_post_ra>
